<compile_context>
chip_gen: v7x
topology: tpu7x:2x2x1
jax: 0.10.0
libtpu: 0.0.40
codegen_flags: <defaults>
</compile_context>

<pallas_src>
import jax
import jax.numpy as jnp
from jax.experimental import pallas as pl
from jax.experimental.pallas import tpu as pltpu


def _posemb_add_kernel(x_ref, pos_ref, o_ref):
    # x_ref, o_ref: (tb, td, HW); pos_ref: (td, HW) — one streaming add,
    # broadcast over the (leading) batch-tile axis.
    o_ref[...] = x_ref[...] + pos_ref[...][None, :, :]


def _pick_tiles(B, D, HW, itemsize, budget_bytes=2 << 20):
    """Pick (tb, td) so that a (tb, td, HW) tile stays under ~2 MiB, td keeps
    sublane alignment (multiple of 8 or full D), and tb divides B."""
    row_bytes = HW * itemsize
    # Channel tile.
    if D * row_bytes <= budget_bytes:
        td = D
    else:
        td = D  # full-dim block is always layout-legal (fallback)
        for cand in range(D, 0, -1):
            if D % cand == 0 and cand % 8 == 0 and cand * row_bytes <= budget_bytes:
                td = cand
                break
    # Batch tile: only grow once the whole channel dim fits a single block.
    tb = 1
    if td == D:
        for cand in range(B, 0, -1):
            if B % cand == 0 and cand * D * row_bytes <= budget_bytes:
                tb = cand
                break
    return tb, td


def _posemb_add(x, pos_table):
    """x: (B, D, H, W); pos_table: (D, H*W) lane-dense positional table."""
    B, D, H, W = x.shape
    HW = H * W
    assert pos_table.shape == (D, HW)

    x_flat = x.reshape(B, D, HW)
    tb, td = _pick_tiles(B, D, HW, jnp.dtype(x.dtype).itemsize)

    out = pl.pallas_call(
        _posemb_add_kernel,
        out_shape=jax.ShapeDtypeStruct((B, D, HW), x.dtype),
        grid_spec=pltpu.PrefetchScalarGridSpec(
            num_scalar_prefetch=0,
            grid=(B // tb, D // td),
            in_specs=[
                pl.BlockSpec((tb, td, HW), lambda b, d: (b, d, 0)),
                # posemb table: same block across the batch axis (VMEM-resident).
                pl.BlockSpec((td, HW), lambda b, d: (d, 0)),
            ],
            out_specs=pl.BlockSpec((tb, td, HW), lambda b, d: (b, d, 0)),
        ),
        compiler_params=pltpu.CompilerParams(
            dimension_semantics=("parallel", "parallel"),
        ),
        # TODO(synk): add input_output_aliases={0: 0} when the caller can
        # donate x (turns the streaming add in-place, drops one HBM alloc).
    )(x_flat, pos_table.astype(x.dtype))

    return out.reshape(B, D, H, W)


def learned_positional_embeddings_2d(x, xemb_weight, yemb_weight):
    """LearnedPositionalEmbeddings2D.forward.
    x: (B, D, H, W); xemb_weight: (H, D); yemb_weight: (W, D)."""
    B, D, H, W = x.shape
    assert xemb_weight.shape == (H, D)
    assert yemb_weight.shape == (W, D)
    # pos[d, h*W + w] = xemb[h, d] + yemb[w, d]  (built once per call, tiny).
    pos = xemb_weight[:, None, :] + yemb_weight[None, :, :]       # (H, W, D)
    pos = jnp.transpose(pos, (2, 0, 1)).reshape(D, H * W)
    return _posemb_add(x, pos)


def learned_positional_embeddings_2d_indep(x, emb_weight):
    """LearnedPositionalEmbeddings2DIndep.forward.
    x: (B, D, H, W); emb_weight: (H*W, D)."""
    B, D, H, W = x.shape
    assert emb_weight.shape == (H * W, D)
    pos = emb_weight.reshape(H, W, D)
    pos = jnp.transpose(pos, (2, 0, 1)).reshape(D, H * W)
    return _posemb_add(x, pos)


if __name__ == "__main__":
    key = jax.random.PRNGKey(0)
    kx, kxe, kye, kc, kce = jax.random.split(key, 5)

    # --- LearnedPositionalEmbeddings2D (x_posembed), small config ---
    H, W, D, B = 16, 16, 32, 2
    xemb_weight = jax.random.normal(kxe, (H, D), dtype=jnp.float32)  # nn.Embedding ~ N(0,1)
    yemb_weight = jax.random.normal(kye, (W, D), dtype=jnp.float32)
    x = jax.random.normal(kx, (B, D, H, W), dtype=jnp.float32)

    out = learned_positional_embeddings_2d(x, xemb_weight, yemb_weight)
    out = jax.block_until_ready(out)

    posemb = xemb_weight[:, None, :] + yemb_weight[None, :, :]       # (H, W, D)
    ref = jnp.transpose(posemb, (2, 0, 1))[None, :, :, :] + x        # (B, D, H, W)
    assert out.shape == (B, D, H, W)
    assert jnp.allclose(out, ref, atol=1e-6), "2D posemb mismatch vs reference"

    # --- LearnedPositionalEmbeddings2DIndep (cell_posembed), small config ---
    Hm, Wm, Dm = 8, 8, 32
    cells = jax.random.normal(kc, (B, Dm, Hm, Wm), dtype=jnp.float32)
    cell_emb = jax.random.normal(kce, (Hm * Wm, Dm), dtype=jnp.float32)

    out_c = learned_positional_embeddings_2d_indep(cells, cell_emb)
    out_c = jax.block_until_ready(out_c)

    pos_c = jnp.transpose(cell_emb.reshape(Hm, Wm, Dm), (2, 0, 1))   # (D, H, W)
    ref_c = pos_c[None, :, :, :] + cells
    assert out_c.shape == (B, Dm, Hm, Wm)
    assert jnp.allclose(out_c, ref_c, atol=1e-6), "indep posemb mismatch vs reference"

    print("KERNEL_OK")
</pallas_src>

<mosaic_0001>
module attributes {stable_mosaic.version = 11 : i64} {
  func.func @_posemb_add_kernel(%arg0: i32, %arg1: i32, %arg2: memref<2x32x256xf32, #tpu.memory_space<vmem>>, %arg3: memref<32x256xf32, #tpu.memory_space<vmem>>, %arg4: memref<2x32x256xf32, #tpu.memory_space<vmem>>) attributes {dimension_semantics = [#tpu.dimension_semantics<parallel>, #tpu.dimension_semantics<parallel>], iteration_bounds = array<i64: 1, 1>, scalar_prefetch = 0 : i64, scratch_operands = 0 : i64, tpu.core_type = #tpu.core_type<tc>, window_params = [{transform_indices = @transform_0, window_bounds = array<i64: 2, 32, 256>}, {transform_indices = @transform_1, window_bounds = array<i64: 32, 256>}, {transform_indices = @transform_2, window_bounds = array<i64: 2, 32, 256>}]} {
    %c0 = arith.constant 0 : index
    %c0_0 = arith.constant 0 : index
    %c0_1 = arith.constant 0 : index
    %0 = vector.load %arg2[%c0, %c0_0, %c0_1] : memref<2x32x256xf32, #tpu.memory_space<vmem>>, vector<2x32x256xf32>
    %c0_2 = arith.constant 0 : index
    %c0_3 = arith.constant 0 : index
    %1 = vector.load %arg3[%c0_2, %c0_3] : memref<32x256xf32, #tpu.memory_space<vmem>>, vector<32x256xf32>
    %2 = vector.shape_cast %1 : vector<32x256xf32> to vector<1x32x256xf32>
    %3 = vector.broadcast %2 : vector<1x32x256xf32> to vector<2x32x256xf32>
    %4 = arith.addf %0, %3 : vector<2x32x256xf32>
    %c0_4 = arith.constant 0 : index
    %c0_5 = arith.constant 0 : index
    %c0_6 = arith.constant 0 : index
    %5 = vector.load %arg4[%c0_4, %c0_5, %c0_6] : memref<2x32x256xf32, #tpu.memory_space<vmem>>, vector<2x32x256xf32>
    tpu.vector_store %arg4[%c0_4, %c0_5, %c0_6], %4 {strides = array<i32>} : memref<2x32x256xf32, #tpu.memory_space<vmem>>, vector<2x32x256xf32>,
    return
  }
  func.func @transform_0(%arg0: i32, %arg1: i32) -> (i32, i32, i32) {
    %c0_i32 = arith.constant 0 : i32
    %c0_i32_0 = arith.constant 0 : i32
    return %arg0, %arg1, %c0_i32 : i32, i32, i32
  }
  func.func @transform_1(%arg0: i32, %arg1: i32) -> (i32, i32) {
    %c0_i32 = arith.constant 0 : i32
    %c0_i32_0 = arith.constant 0 : i32
    return %arg1, %c0_i32 : i32, i32
  }
  func.func @transform_2(%arg0: i32, %arg1: i32) -> (i32, i32, i32) {
    %c0_i32 = arith.constant 0 : i32
    %c0_i32_0 = arith.constant 0 : i32
    return %arg0, %arg1, %c0_i32 : i32, i32, i32
  }
}

</mosaic_0001>

<bundles_post_ra>
// kernel: tpu_custom_call.1
= control target key start
LH: loop header
LB: loop body
LE: loop exit
PB: predicated region body
PF: predicated region fallthrough
CT: control target
= control target key end

     0   :  { %7 = vsyncpa [#allocation3], 0  ;;  %s256_s0 = inlined_call_operand.hbm [shape: f32[2,32,256], index: 0, kind: input, shape index: {}]   ;;  %s257_s1 = inlined_call_operand.hbm [shape: f32[32,256], index: 1, kind: input, shape index: {}]   ;;  %s258_s2 = inlined_call_operand.hbm [shape: f32[2,32,256], index: 2, kind: output, shape index: {}]  }
   0x1   :  { %8 = vsyncpa [#allocation6], 0 }
   0x2   :  { %9 = vsyncpa [#allocation4], 0  ;;  %s191_s9 = smov [#allocation2]   ;;  %s119_s13 = scalar_lea.hbm %s256_s0, 2048 }
   0x3   :  { %s15_s10 = sshll.u32 %s191_s9, 4  ;;  %p120_p0 = scmp.ne.s32.totalorder %s256_s0, %s119_s13  ;;  %s16_s10 = int_to_ptr.vmem [resolvable:$true] %s15_s10 }
   0x4   :  { %p123_p1 = scmp.lt.u32.totalorder %s119_s13, %s256_s0 }
   0x6   :  { %p125_p2 = pnand %p123_p1, %p120_p0 }
   0x8   :  { %128 = shalt.err (!%p125_p2)
}
   0x9   :  { %s129_s18 = scalar_lea.vmem %s16_s10, 2048  ;;  %p134_p4 = scmp.lt.s32.totalorder %s16_s10, %s16_s10 }
   0xa   :  { %p130_p3 = scmp.ne.s32.totalorder %s16_s10, %s129_s18  ;;  %p135_p5 = scmp.lt.s32.totalorder %s129_s18, %s129_s18 }
   0xc   :  { %p136_p6 = por %p135_p5, %p134_p4 }
   0xe   :  { %p137_p7 = pnand %p136_p6, %p130_p3 }
  0x10   :  { %140 = shalt.err (!%p137_p7)
}
  0x11   :  { %s192_s19 = smov 256   ;;  %s193_s20 = smov 16  }
  0x12   :  { %21 = dma.hbm_to_vmem [thread:$0]  %s256_s0, 2048, %s16_s10, [#allocation3], %s192_s19, %s192_s19, %s193_s20  }
  0x13   :  { %s194_s23 = smov [#allocation5]   ;;  %s141_s27 = scalar_lea.hbm %s257_s1, 1024 }
  0x14   :  { %s27_s24 = sshll.u32 %s194_s23, 4  ;;  %p142_p8 = scmp.ne.s32.totalorder %s257_s1, %s141_s27  ;;  %s28_s24 = int_to_ptr.vmem [resolvable:$true] %s27_s24 }
  0x15   :  { %p145_p9 = scmp.lt.u32.totalorder %s141_s27, %s257_s1 }
  0x17   :  { %p147_p10 = pnand %p145_p9, %p142_p8 }
  0x19   :  { %150 = shalt.err (!%p147_p10)
}
  0x1a   :  { %s151_s4 = scalar_lea.vmem %s28_s24, 1024  ;;  %p156_p12 = scmp.lt.s32.totalorder %s28_s24, %s28_s24 }
  0x1b   :  { %p152_p11 = scmp.ne.s32.totalorder %s28_s24, %s151_s4  ;;  %p157_p13 = scmp.lt.s32.totalorder %s151_s4, %s151_s4 }
  0x1d   :  { %p158_p0 = por %p157_p13, %p156_p12 }
  0x1f   :  { %p159_p1 = pnand %p158_p0, %p152_p11 }
  0x21   :  { %162 = shalt.err (!%p159_p1)
}
  0x22   :  { %33 = dma.hbm_to_vmem [thread:$0]  %s257_s1, 1024, %s28_s24, [#allocation6], %s192_s19, %s192_s19, %s193_s20  }
  0x23   :  { %185 = dma.done.wait [#allocation3], 2048  }
  0x24   :  { %186 = vsyncadd [#allocation3], 4294965248 }
  0x25   :  { %187 = dma.done.wait [#allocation6], 1024  }
  0x26   :  { %188 = vsyncadd [#allocation6], 4294966272  ;;  %v40_v0 = vld [vmem:[#allocation2] sm:$0xff]  ;;  %v41_v2 = vld [vmem:[#allocation2 + $0x8] sm:$0xff]  ;;  %s195_s1 = smov [#allocation7]  }
  0x27   :  { %v56_v1 = vld [vmem:[#allocation5] sm:$0xff]  ;;  %v57_v4 = vld [vmem:[#allocation5 + $0x8] sm:$0xff]  ;;  %v42_v5 = vld [vmem:[#allocation2 + $0x10] sm:$0xff]  ;;  %s101_s6 = sshll.u32 %s195_s1, 4  ;;  %s102_s6 = int_to_ptr.vmem [resolvable:$true] %s101_s6 }
  0x28   :  { %v64_v3 = vadd.f32 %v56_v1, %v40_v0  ;;  %v58_v6 = vld [vmem:[#allocation5 + $0x10] sm:$0xff]  ;;  %v65_v7 = vadd.f32 %v57_v4, %v41_v2  ;;  %v43_v9 = vld [vmem:[#allocation2 + $0x18] sm:$0xff]  ;;  %v44_v11 = vld [vmem:[#allocation2 + $0x20] sm:$0xff]  ;;  %s163_s7 = scalar_lea.vmem %s102_s6, 2048  ;;  %p168_p3 = scmp.lt.s32.totalorder %s102_s6, %s102_s6 }
  0x29   :  { %v66_v8 = vadd.f32 %v58_v6, %v42_v5  ;;  %v59_v10 = vld [vmem:[#allocation5 + $0x18] sm:$0xff]  ;;  %v60_v13 = vld [vmem:[#allocation5 + $0x20] sm:$0xff]  ;;  %v45_v14 = vld [vmem:[#allocation2 + $0x28] sm:$0xff]  ;;  %p164_p2 = scmp.ne.s32.totalorder %s102_s6, %s163_s7  ;;  %p169_p4 = scmp.lt.s32.totalorder %s163_s7, %s163_s7 }
  0x2a   :  { %80 = vst [vmem:[#allocation7] sm:$0xff] %v64_v3  ;;  %v67_v12 = vadd.f32 %v59_v10, %v43_v9  ;;  %v61_v15 = vld [vmem:[#allocation5 + $0x28] sm:$0xff]  ;;  %81 = vst [vmem:[#allocation7 + $0x8] sm:$0xff] %v65_v7  ;;  %v68_v16 = vadd.f32 %v60_v13, %v44_v11  ;;  %v46_v18 = vld [vmem:[#allocation2 + $0x30] sm:$0xff] }
  0x2b   :  { %82 = vst [vmem:[#allocation7 + $0x10] sm:$0xff] %v66_v8  ;;  %v69_v17 = vadd.f32 %v61_v15, %v45_v14  ;;  %v62_v19 = vld [vmem:[#allocation5 + $0x30] sm:$0xff]  ;;  %v47_v20 = vld [vmem:[#allocation2 + $0x38] sm:$0xff]  ;;  %v48_v23 = vld [vmem:[#allocation2 + $0x40] sm:$0xff]  ;;  %p170_p5 = por %p169_p4, %p168_p3 }
  0x2c   :  { %83 = vst [vmem:[#allocation7 + $0x18] sm:$0xff] %v67_v12  ;;  %v70_v21 = vadd.f32 %v62_v19, %v46_v18  ;;  %v63_v22 = vld [vmem:[#allocation5 + $0x38] sm:$0xff]  ;;  %v49_v24 = vld [vmem:[#allocation2 + $0x48] sm:$0xff]  ;;  %84 = vst [vmem:[#allocation7 + $0x20] sm:$0xff] %v68_v16  ;;  %v72_v26 = vadd.f32 %v56_v1, %v48_v23 }
  0x2d   :  { %85 = vst [vmem:[#allocation7 + $0x28] sm:$0xff] %v69_v17  ;;  %v71_v25 = vadd.f32 %v63_v22, %v47_v20  ;;  %v73_v27 = vadd.f32 %v57_v4, %v49_v24  ;;  %v50_v28 = vld [vmem:[#allocation2 + $0x50] sm:$0xff]  ;;  %v51_v29 = vld [vmem:[#allocation2 + $0x58] sm:$0xff]  ;;  %v52_v30 = vld [vmem:[#allocation2 + $0x60] sm:$0xff]  ;;  %p171_p6 = pnand %p170_p5, %p164_p2 }
  0x2e   :  { %86 = vst [vmem:[#allocation7 + $0x30] sm:$0xff] %v70_v21  ;;  %v74_v31 = vadd.f32 %v58_v6, %v50_v28  ;;  %v75_v32 = vadd.f32 %v59_v10, %v51_v29  ;;  %v76_v33 = vadd.f32 %v60_v13, %v52_v30  ;;  %v53_v34 = vld [vmem:[#allocation2 + $0x68] sm:$0xff]  ;;  %v54_v35 = vld [vmem:[#allocation2 + $0x70] sm:$0xff]  ;;  %v55_v36 = vld [vmem:[#allocation2 + $0x78] sm:$0xff] }
  0x2f   :  { %87 = vst [vmem:[#allocation7 + $0x38] sm:$0xff] %v71_v25  ;;  %88 = vst [vmem:[#allocation7 + $0x40] sm:$0xff] %v72_v26  ;;  %v77_v37 = vadd.f32 %v61_v15, %v53_v34  ;;  %v78_v38 = vadd.f32 %v62_v19, %v54_v35  ;;  %v79_v39 = vadd.f32 %v63_v22, %v55_v36 }
  0x30   :  { %89 = vst [vmem:[#allocation7 + $0x48] sm:$0xff] %v73_v27  ;;  %90 = vst [vmem:[#allocation7 + $0x50] sm:$0xff] %v74_v31 }
  0x31   :  { %91 = vst [vmem:[#allocation7 + $0x58] sm:$0xff] %v75_v32  ;;  %92 = vst [vmem:[#allocation7 + $0x60] sm:$0xff] %v76_v33 }
  0x32   :  { %93 = vst [vmem:[#allocation7 + $0x68] sm:$0xff] %v77_v37  ;;  %94 = vst [vmem:[#allocation7 + $0x70] sm:$0xff] %v78_v38 }
  0x33   :  { %95 = vst [vmem:[#allocation7 + $0x78] sm:$0xff] %v79_v39 }
  0x34   :  { %174 = shalt.err (!%p171_p6)
}
  0x35   :  { %s175_s10 = scalar_lea.hbm %s258_s2, 2048 }
  0x36   :  { %p176_p7 = scmp.ne.s32.totalorder %s258_s2, %s175_s10  ;;  %p179_p8 = scmp.lt.u32.totalorder %s175_s10, %s258_s2 }
  0x38   :  { %p181_p9 = pnand %p179_p8, %p176_p7 }
  0x3a   :  { %184 = shalt.err (!%p181_p9)
}
  0x3b   :  { %107 = dma.vmem_to_hbm [thread:$0]  %s102_s6, 2048, %s258_s2, [#allocation4], %s192_s19, %s192_s19, %s193_s20  }
  0x3c   :  { %189 = dma.done.wait [#allocation4], 2048  }
  0x3d   :  { %190 = vsyncadd [#allocation4], 4294965248 }
  0x3e   :  { %111 = vsyncpa [#allocation3], 1 }
  0x3f   :  { %112 = vsyncpa [#allocation6], 1 }
  0x40   :  { %113 = vsyncpa [#allocation4], 1 }

</bundles_post_ra>
